<compile_context>
chip_gen: v7x
topology: tpu7x:2x2x1
jax: 0.10.0
libtpu: 0.0.40
codegen_flags: <defaults>
</compile_context>

<pallas_src>
import jax
import jax.numpy as jnp
from jax import lax
from jax.experimental import pallas as pl
from jax.experimental.pallas import tpu as pltpu


# ----------------------------- Pallas kernel ------------------------------ #
def _conv1x1_kernel(x_ref, w_ref, b_ref, o_ref):
    # x: (tm, K) bf16, w: (K, F) bf16, b: (1, F) f32 -> o: (tm, F) f32
    acc = jnp.dot(x_ref[...], w_ref[...], preferred_element_type=jnp.float32)
    o_ref[...] = (acc + b_ref[...]).astype(o_ref.dtype)


def _pick_tm(M):
    # Largest row tile (multiple of 8) up to 512 that still gives >= 2 grid
    # steps: big tiles keep pipelined efficiency high, >=2 steps lets v7x's
    # two TensorCores both run ("parallel" grid axis).
    for tm in (512, 256, 128, 64, 32, 16, 8):
        if M >= 2 * tm:
            return tm
    return 8


def _conv1x1_matmul(x_mk_bf16, w_kf_bf16, b_f32):
    """out = x @ w + b   (bf16 operands, f32 accumulate/output) via Pallas."""
    M, K = x_mk_bf16.shape
    F = w_kf_bf16.shape[1]
    tm = _pick_tm(M)
    num_tiles = pl.cdiv(M, tm)
    Mp = num_tiles * tm
    if Mp != M:
        x_mk_bf16 = jnp.pad(x_mk_bf16, ((0, Mp - M), (0, 0)))

    cost = pl.CostEstimate(
        flops=2 * Mp * K * F,
        transcendentals=0,
        bytes_accessed=Mp * K * 2 + K * F * 2 + F * 4 + Mp * F * 4,
    )

    out = pl.pallas_call(
        _conv1x1_kernel,
        out_shape=jax.ShapeDtypeStruct((Mp, F), jnp.float32),
        grid_spec=pltpu.PrefetchScalarGridSpec(
            num_scalar_prefetch=0,
            grid=(num_tiles,),
            in_specs=[
                pl.BlockSpec((tm, K), lambda i: (i, 0)),   # activation rows
                pl.BlockSpec((K, F), lambda i: (0, 0)),    # weight (resident)
                pl.BlockSpec((1, F), lambda i: (0, 0)),    # bias (resident)
            ],
            out_specs=pl.BlockSpec((tm, F), lambda i: (i, 0)),
        ),
        compiler_params=pltpu.CompilerParams(
            dimension_semantics=("parallel",)),
        cost_estimate=cost,
    )(x_mk_bf16, w_kf_bf16, b_f32.reshape(1, F))

    return out[:M]


# ------------------------------ LandmarkHead ------------------------------- #
def landmark_head(params, x_nchw):
    """Forward pass.  x: (N, Cin, H, W) f32 -> (N, H*W*num_anchors, 136) f32."""
    N, C, H, W = x_nchw.shape
    w = params["w"]                       # (Cin, num_anchors*136)
    b = params["b"]                       # (num_anchors*136,)
    F = w.shape[1]

    # NCHW -> NHWC is required by the module's own output permute/view; it is
    # pure data movement handled by XLA (glue), all FLOPs are in the kernel.
    x_nhwc = jnp.transpose(x_nchw, (0, 2, 3, 1))
    xm = x_nhwc.reshape(N * H * W, C).astype(jnp.bfloat16)
    wb = w.astype(jnp.bfloat16)

    out = _conv1x1_matmul(xm, wb, b)      # (N*H*W, F) f32
    # permute(0,2,3,1).view(N, -1, 136): channel dim F = num_anchors*136 is
    # contiguous and anchor-major, so a plain reshape matches PyTorch exactly.
    return out.reshape(N, H * W * (F // 136), 136)


def init_params(key, inchannels=64, num_anchors=3):
    kw, kb = jax.random.split(key, 2)
    F = num_anchors * 136
    return {
        "w": 0.05 * jax.random.normal(kw, (inchannels, F), dtype=jnp.float32),
        "b": 0.05 * jax.random.normal(kb, (F,), dtype=jnp.float32),
    }


# ----------------------------- pure-JAX reference -------------------------- #
def reference_landmark_head(params, x_nchw):
    N, C, H, W = x_nchw.shape
    x_nhwc = jnp.transpose(x_nchw, (0, 2, 3, 1))
    out = jnp.einsum("nhwc,cf->nhwf", x_nhwc, params["w"],
                     precision=lax.Precision.HIGHEST) + params["b"]
    return out.reshape(N, -1, 136)


# ---------------------------------- main ----------------------------------- #
if __name__ == "__main__":
    key = jax.random.PRNGKey(0)
    N, inchannels, H, W = 2, 64, 16, 16
    num_anchors = 3

    kx, kp = jax.random.split(key, 2)
    x = jax.random.normal(kx, (N, inchannels, H, W), dtype=jnp.float32)
    params = init_params(kp, inchannels=inchannels, num_anchors=num_anchors)

    fn = jax.jit(landmark_head)
    out = fn(params, x)
    out = jax.block_until_ready(out)

    # shape check vs PyTorch semantics: (N, H*W*num_anchors, 136)
    assert out.shape == (N, H * W * num_anchors, 136), out.shape
    assert out.dtype == jnp.float32

    # numeric check vs f32 reference (bf16 MXU operands -> loose tolerance)
    ref = reference_landmark_head(params, x)
    err = float(jnp.max(jnp.abs(out - ref)))
    assert jnp.allclose(out, ref, atol=3e-2, rtol=3e-2), err

    print("KERNEL_OK")
</pallas_src>

<mosaic_0001>
module attributes {stable_mosaic.version = 11 : i64} {
  func.func @_conv1x1_kernel(%arg0: i32, %arg1: memref<256x64xbf16, #tpu.memory_space<vmem>>, %arg2: memref<64x408xbf16, #tpu.memory_space<vmem>>, %arg3: memref<1x408xf32, #tpu.memory_space<vmem>>, %arg4: memref<256x408xf32, #tpu.memory_space<vmem>>) attributes {dimension_semantics = [#tpu.dimension_semantics<parallel>], iteration_bounds = array<i64: 2>, scalar_prefetch = 0 : i64, scratch_operands = 0 : i64, tpu.core_type = #tpu.core_type<tc>, window_params = [{transform_indices = @transform_0, window_bounds = array<i64: 256, 64>}, {pipeline_mode = #tpu.pipeline_mode<synchronous>, transform_indices = @transform_1, window_bounds = array<i64: 64, 408>}, {pipeline_mode = #tpu.pipeline_mode<synchronous>, transform_indices = @transform_2, window_bounds = array<i64: 1, 408>}, {transform_indices = @transform_3, window_bounds = array<i64: 256, 408>}]} {
    %c0 = arith.constant 0 : index
    %c0_0 = arith.constant 0 : index
    %0 = vector.load %arg1[%c0, %c0_0] : memref<256x64xbf16, #tpu.memory_space<vmem>>, vector<256x64xbf16>
    %c0_1 = arith.constant 0 : index
    %c0_2 = arith.constant 0 : index
    %1 = vector.load %arg2[%c0_1, %c0_2] : memref<64x408xbf16, #tpu.memory_space<vmem>>, vector<64x408xbf16>
    %cst = arith.constant dense<0.000000e+00> : vector<256x408xf32>
    %2 = tpu.matmul %0, %1, %cst {dimension_numbers = #tpu.dot_dimension_numbers<[1], [0], [0], [1], [0, 0, 1, 1], [], []>} : vector<256x64xbf16>, vector<64x408xbf16>, vector<256x408xf32> -> vector<256x408xf32>
    %c0_3 = arith.constant 0 : index
    %c0_4 = arith.constant 0 : index
    %3 = vector.load %arg3[%c0_3, %c0_4] : memref<1x408xf32, #tpu.memory_space<vmem>>, vector<1x408xf32>
    %4 = vector.broadcast %3 : vector<1x408xf32> to vector<256x408xf32>
    %5 = arith.addf %2, %4 : vector<256x408xf32>
    %c0_5 = arith.constant 0 : index
    %c0_6 = arith.constant 0 : index
    %6 = vector.load %arg4[%c0_5, %c0_6] : memref<256x408xf32, #tpu.memory_space<vmem>>, vector<256x408xf32>
    tpu.vector_store %arg4[%c0_5, %c0_6], %5 {strides = array<i32>} : memref<256x408xf32, #tpu.memory_space<vmem>>, vector<256x408xf32>,
    return
  }
  func.func @transform_0(%arg0: i32) -> (i32, i32) {
    %c0_i32 = arith.constant 0 : i32
    %c0_i32_0 = arith.constant 0 : i32
    return %arg0, %c0_i32 : i32, i32
  }
  func.func @transform_1(%arg0: i32) -> (i32, i32) {
    %c0_i32 = arith.constant 0 : i32
    %c0_i32_0 = arith.constant 0 : i32
    %c0_i32_1 = arith.constant 0 : i32
    return %c0_i32, %c0_i32_0 : i32, i32
  }
  func.func @transform_2(%arg0: i32) -> (i32, i32) {
    %c0_i32 = arith.constant 0 : i32
    %c0_i32_0 = arith.constant 0 : i32
    %c0_i32_1 = arith.constant 0 : i32
    return %c0_i32, %c0_i32_0 : i32, i32
  }
  func.func @transform_3(%arg0: i32) -> (i32, i32) {
    %c0_i32 = arith.constant 0 : i32
    %c0_i32_0 = arith.constant 0 : i32
    return %arg0, %c0_i32 : i32, i32
  }
}

</mosaic_0001>

<bundles_post_ra>
// kernel: landmark_head.1
= control target key start
LH: loop header
LB: loop body
LE: loop exit
PB: predicated region body
PF: predicated region fallthrough
CT: control target
= control target key end

     0   :  { %8 = vsyncpa [#allocation3], 0  ;;  %s1255_s12 = smov 0   ;;  %s1746_s0 = inlined_call_operand.vmem [shape: bf16[512,64], index: 0, kind: input, shape index: {}]   ;;  %s1747_s1 = inlined_call_operand.vmem [shape: bf16[64,408], index: 1, kind: input, shape index: {}]   ;;  %s1748_s2 = inlined_call_operand.hbm [shape: f32[1,408], index: 2, kind: input, shape index: {}]   ;;  %s1749_s3 = inlined_call_operand.vmem [shape: f32[512,408], index: 3, kind: output, shape index: {}]  }
   0x1 LB: > { %s1054_s13 = sadd.s32 4294967295, %s1231_s12   ;;  %p1056_p0 = scmp.ge.s32.totalorder %s1231_s12, 1  ;;  %s1231_s12 = sphi %s1255_s12, %s14_s12  }
   0x2   : > { %p113_p1 = scmp.lt.s32.totalorder %s1231_s12, 3  ;;  %p1269_p3 = scmp.eq.s32.totalorder %s1054_s13, 0 }
   0x3   : > { %s1233_s16 = smov [#allocation2]   ;;  %s1193_s21 = scalar_lea.hbm %s1748_s2, 64 }
   0x4   : > { %p1263_p2 = pnand %p1056_p0, %p113_p1  ;;  %s129_s17 = sshll.u32 %s1233_s16, 4  ;;  %s130_s17 = int_to_ptr.vmem [resolvable:$true] %s129_s17 }
   0x5   : > { %s1754_s15 = scalar_select %p1269_p3, 1, 0 }
   0x6   : > { %s1753_s14 = scalar_select %p1263_p2, 1, 0 }
   0x7   : > { %p1137_p4 = pneg %p1263_p2  ;;  %p1194_p6 = scmp.ne.s32.totalorder %s1748_s2, %s1193_s21 }
   0x8   : > { %p1200_p10 = scmp.lt.u32.totalorder %s1193_s21, %s1748_s2 }
   0x9   : > { %p1277_p5 = pnand %p1269_p3, %p1137_p4 }
   0xb   : > { %p1195_p7 = pneg %p1277_p5 }
   0xd   : > { %p1196_p8 = pnand %p1195_p7, %p1194_p6 }
   0xf   : > { %p1197_p9 = pneg %p1196_p8 }
  0x11   : > { %p1202_p11 = pnand %p1200_p10, %p1197_p9 }
  0x13   : > { %1205 = shalt.err (!%p1202_p11)
}
  0x14   : > { %s1206_s26 = scalar_lea.vmem %s130_s17, 64  ;;  %p1214_p1 = scmp.lt.s32.totalorder %s130_s17, %s130_s17 }
  0x15   : > { %p1207_p12 = scmp.ne.s32.totalorder %s130_s17, %s1206_s26  ;;  %p1215_p4 = scmp.lt.s32.totalorder %s1206_s26, %s1206_s26 }
  0x17   : > { %p1209_p13 = pnand %p1207_p12, %p1195_p7  ;;  %p1216_p3 = por %p1215_p4, %p1214_p1 }
  0x19   : > { %p1210_p0 = pneg %p1209_p13 }
  0x1b   : > { %p1217_p2 = pnand %p1216_p3, %p1210_p0 }
  0x1d   : > { %1220 = shalt.err (!%p1217_p2)
}
  0x1e   : > { %1140 = dma.hbm_to_vmem [thread:$0]  (!%p1277_p5), %s1748_s2, 64, %s130_s17, [#allocation3]  }
  0x1f   : > { %p1756_p6 = scmp.ne.s32.totalorder %s1753_s14, 0 }
  0x20   : > { %p1757_p8 = scmp.ne.s32.totalorder (!%p1756_p6), %s1754_s15, 0 }
  0x21   : > { %151 = sbr.rel (%p1756_p6) target bundleno = 397 (0x18d), region = 32 }
  0x28   : > { %1226 = dma.done.wait (%p1757_p8), [#allocation3], 64  }
  0x29   : > { %1228 = vsyncadd (%p1757_p8), [#allocation3], 4294967232  ;;  %v1234_v0 = vmov 0   ;;  %s1061_s29 = sshll.u32 %s1054_s13, 5  ;;  %v1153_v1 = vld [vmem:[%s1747_s1 + $0x4] ss:$16 sps:$4 sm:$0xff]   ;;  %v240_v33 = vlaneseq }
  0x2a   : > { %501 = vmatprep.mubr.bf16.mxu0 %v1234_v0  ;;  %694 = vmatprep.mubr.bf16.mxu1 %v1234_v0  ;;  %p177_p2 = scmp.lt.s32.totalorder %s1061_s29, 63  ;;  %v1155_v2 = vld [vmem:[%s1747_s1 + $0xc] ss:$16 sps:$4 sm:$0xff]   ;;  %v1157_v3 = vld [vmem:[%s1747_s1] ss:$16 sps:$4 sm:$0xff]   ;;  %vm420_vm0 = vcmask 523264  }
  0x2b   : > { %469 = vmatprep.subr.bf16.mxu0 %v1153_v1  ;;  %v1158_v4 = vld [vmem:[%s1747_s1 + $0x8] ss:$16 sps:$4 sm:$0xff]   ;;  %662 = vmatprep.subr.bf16.mxu1 %v1155_v2  ;;  %v1159_v5 = vld [vmem:[%s1747_s1 + $0x24] ss:$16 sps:$4 sm:$0xff]   ;;  %v1161_v6 = vld [vmem:[%s1747_s1 + $0x2c] ss:$16 sps:$4 sm:$0xff]  }
  0x2c   : > { %s1759_s29 = smov (!%p177_p2, %s1061_s29), 63  ;;  %470 = vmatpush1.bf16.msra.mxu0 %v1157_v3  ;;  %663 = vmatpush1.bf16.msra.mxu1 %v1158_v4  ;;  %v1163_v7 = vld [vmem:[%s1747_s1 + $0x20] ss:$16 sps:$4 sm:$0xff]   ;;  %v1164_v8 = vld [vmem:[%s1747_s1 + $0x28] ss:$16 sps:$4 sm:$0xff]   ;;  %v241_v34 = vshrl.u32 %v240_v33, 7 }
  0x2d   : > { %471 = vmatprep.subr.bf16.mxu0 %v1159_v5  ;;  %664 = vmatprep.subr.bf16.mxu1 %v1161_v6  ;;  %v1165_v9 = vld [vmem:[%s1747_s1 + $0x44] ss:$16 sps:$4 sm:$0xff]   ;;  %s1062_s22 = sshll.u32 %s1759_s29, 2  ;;  %v1167_v10 = vld [vmem:[%s1747_s1 + $0x4c] ss:$16 sps:$4 sm:$0xff]   ;;  %s1132_s15 = sshll.u32 %s1759_s29, 5 }
  0x2e   : > { %v1169_v11 = vld [vmem:[%s1747_s1 + $0x40] ss:$16 sps:$4 sm:$0xff]   ;;  %v1170_v12 = vld [vmem:[%s1747_s1 + $0x48] ss:$16 sps:$4 sm:$0xff]   ;;  %v1171_v13 = vld [vmem:[%s1747_s1 + $0x64] ss:$16 sps:$4 sm:$0xff]   ;;  %s1355_s9 = scalar_lea.vmem %s1746_s0, %s1062_s22  ;;  %s1453_s18 = scalar_lea.vmem %s1749_s3, %s1132_s15 }
  0x2f   : > { %v1173_v14 = vld [vmem:[%s1747_s1 + $0x6c] ss:$16 sps:$4 sm:$0xff]   ;;  %v1175_v15 = vld [vmem:[%s1747_s1 + $0x60] ss:$16 sps:$4 sm:$0xff]   ;;  %v1176_v16 = vld [vmem:[%s1747_s1 + $0x68] ss:$16 sps:$4 sm:$0xff]  }
  0x30   : > { %472 = vmatpush1.bf16.msra.mxu0 %v1163_v7  ;;  %665 = vmatpush1.bf16.msra.mxu1 %v1164_v8  ;;  %v1177_v17 = vld [vmem:[%s1355_s9] sm:$0xff]   ;;  %v1178_v18 = vld [vmem:[%s1355_s9 + $0x8] sm:$0xff]   ;;  %v1179_v19 = vld [vmem:[%s1355_s9 + $0x10] sm:$0xff]   ;;  %v242_v35 = vsub.s32 0, %v241_v34  ;;  %v250_v36 = vsub.s32 2, %v241_v34  ;;  %v246_v38 = vsub.s32 1, %v241_v34 }
  0x31   : > { %473 = vmatprep.subr.bf16.mxu0 %v1165_v9  ;;  %666 = vmatprep.subr.bf16.mxu1 %v1167_v10  ;;  %v1180_v20 = vld [vmem:[%s1355_s9 + $0x18] sm:$0xff]   ;;  %v1181_v21 = vld [vmem:[%s1355_s9 + $0x20] sm:$0xff]   ;;  %v1182_v22 = vld [vmem:[%s1355_s9 + $0x28] sm:$0xff]   ;;  %v254_v39 = vsub.s32 3, %v241_v34  ;;  %vm858_vm1 = vcmask 195584  }
  0x32   : > { %v1183_v23 = vld [vmem:[%s1355_s9 + $0x30] sm:$0xff]   ;;  %v1184_v24 = vld [vmem:[%s1355_s9 + $0x38] sm:$0xff]   ;;  %v1185_v25 = vld [vmem:[%s1355_s9 + $0x40] sm:$0xff]  }
  0x33   : > { %v1186_v26 = vld [vmem:[%s1355_s9 + $0x48] sm:$0xff]   ;;  %v1187_v27 = vld [vmem:[%s1355_s9 + $0x50] sm:$0xff]   ;;  %v1188_v28 = vld [vmem:[%s1355_s9 + $0x58] sm:$0xff]  }
  0x34   : > { %474 = vmatpush1.bf16.msra.mxu0 %v1169_v11  ;;  %667 = vmatpush1.bf16.msra.mxu1 %v1170_v12  ;;  %v1189_v29 = vld [vmem:[%s1355_s9 + $0x60] sm:$0xff]   ;;  %v1190_v30 = vld [vmem:[%s1355_s9 + $0x68] sm:$0xff]   ;;  %v1191_v31 = vld [vmem:[%s1355_s9 + $0x70] sm:$0xff]  }
  0x35   : > { %475 = vmatprep.subr.bf16.mxu0 %v1171_v13  ;;  %668 = vmatprep.subr.bf16.mxu1 %v1173_v14  ;;  %v1192_v32 = vld [vmem:[%s1355_s9 + $0x78] sm:$0xff]   ;;  %v238_v37 = vld [vmem:[#allocation2] sm:$0xf] }
  0x36   : > { %v1442_v40 = vrot.slane %v238_v37, %v242_v35  ;;  %v1444_v41 = vrot.slane %v238_v37, %v250_v36  ;;  %v1446_v42 = vrot.slane %v238_v37, %v246_v38  ;;  %v1448_v43 = vrot.slane %v238_v37, %v254_v39 }
  0x38   : > { %476 = vmatpush1.bf16.msra.mxu0 %v1175_v15  ;;  %669 = vmatpush1.bf16.msra.mxu1 %v1176_v16 }
  0x3b   : > { %1098 = vmatmul.mubr.msk.bf16.vlgmr.msra.gmra.mrb[0].mxu0 %vm420_vm0, %v1177_v17  ;;  %1114 = vmatmul.mubr.msk.bf16.vlgmr.msra.gmra.mrb[0].mxu1 %vm420_vm0, %v1177_v17 }
  0x3c   : > { %511 = vmatprep.mubr.bf16.mxu0 %v1234_v0  ;;  %704 = vmatprep.mubr.bf16.mxu1 %v1234_v0 }
  0x43   : > { %1099 = vmatmul.mubr.msk.bf16.gmra.mrb[4].mxu0 %vm420_vm0, %v1178_v18  ;;  %1115 = vmatmul.mubr.msk.bf16.gmra.mrb[4].mxu1 %vm420_vm0, %v1178_v18 }
  0x44   : > { %521 = vmatprep.mubr.bf16.mxu0 %v1234_v0  ;;  %714 = vmatprep.mubr.bf16.mxu1 %v1234_v0 }
  0x4b   : > { %1100 = vmatmul.mubr.msk.bf16.gmra.mrb[8].mxu0 %vm420_vm0, %v1179_v19  ;;  %1116 = vmatmul.mubr.msk.bf16.gmra.mrb[8].mxu1 %vm420_vm0, %v1179_v19 }
  0x4c   : > { %531 = vmatprep.mubr.bf16.mxu0 %v1234_v0  ;;  %724 = vmatprep.mubr.bf16.mxu1 %v1234_v0 }
  0x53   : > { %1101 = vmatmul.mubr.msk.bf16.gmra.mrb[12].mxu0 %vm420_vm0, %v1180_v20  ;;  %1117 = vmatmul.mubr.msk.bf16.gmra.mrb[12].mxu1 %vm420_vm0, %v1180_v20 }
  0x54   : > { %541 = vmatprep.mubr.bf16.mxu0 %v1234_v0  ;;  %734 = vmatprep.mubr.bf16.mxu1 %v1234_v0 }
  0x5b   : > { %1102 = vmatmul.mubr.msk.bf16.gmra.mrb[16].mxu0 %vm420_vm0, %v1181_v21  ;;  %1118 = vmatmul.mubr.msk.bf16.gmra.mrb[16].mxu1 %vm420_vm0, %v1181_v21 }
  0x5c   : > { %551 = vmatprep.mubr.bf16.mxu0 %v1234_v0  ;;  %744 = vmatprep.mubr.bf16.mxu1 %v1234_v0 }
  0x63   : > { %1103 = vmatmul.mubr.msk.bf16.gmra.mrb[20].mxu0 %vm420_vm0, %v1182_v22  ;;  %1119 = vmatmul.mubr.msk.bf16.gmra.mrb[20].mxu1 %vm420_vm0, %v1182_v22 }
  0x64   : > { %561 = vmatprep.mubr.bf16.mxu0 %v1234_v0  ;;  %754 = vmatprep.mubr.bf16.mxu1 %v1234_v0 }
  0x6b   : > { %1104 = vmatmul.mubr.msk.bf16.gmra.mrb[24].mxu0 %vm420_vm0, %v1183_v23  ;;  %1120 = vmatmul.mubr.msk.bf16.gmra.mrb[24].mxu1 %vm420_vm0, %v1183_v23 }
  0x6c   : > { %571 = vmatprep.mubr.bf16.mxu0 %v1234_v0  ;;  %764 = vmatprep.mubr.bf16.mxu1 %v1234_v0 }
  0x73   : > { %1105 = vmatmul.mubr.msk.bf16.gmra.mrb[28].mxu0 %vm420_vm0, %v1184_v24  ;;  %1121 = vmatmul.mubr.msk.bf16.gmra.mrb[28].mxu1 %vm420_vm0, %v1184_v24 }
  0x74   : > { %581 = vmatprep.mubr.bf16.mxu0 %v1234_v0  ;;  %774 = vmatprep.mubr.bf16.mxu1 %v1234_v0 }
  0x7b   : > { %1106 = vmatmul.mubr.msk.bf16.gmra.mrb[32].mxu0 %vm420_vm0, %v1185_v25  ;;  %1122 = vmatmul.mubr.msk.bf16.gmra.mrb[32].mxu1 %vm420_vm0, %v1185_v25 }
  0x7c   : > { %591 = vmatprep.mubr.bf16.mxu0 %v1234_v0  ;;  %784 = vmatprep.mubr.bf16.mxu1 %v1234_v0 }
  0x83   : > { %1107 = vmatmul.mubr.msk.bf16.gmra.mrb[36].mxu0 %vm420_vm0, %v1186_v26  ;;  %1123 = vmatmul.mubr.msk.bf16.gmra.mrb[36].mxu1 %vm420_vm0, %v1186_v26 }
  0x84   : > { %601 = vmatprep.mubr.bf16.mxu0 %v1234_v0  ;;  %794 = vmatprep.mubr.bf16.mxu1 %v1234_v0 }
  0x8b   : > { %1108 = vmatmul.mubr.msk.bf16.gmra.mrb[40].mxu0 %vm420_vm0, %v1187_v27  ;;  %1124 = vmatmul.mubr.msk.bf16.gmra.mrb[40].mxu1 %vm420_vm0, %v1187_v27 }
  0x8c   : > { %611 = vmatprep.mubr.bf16.mxu0 %v1234_v0  ;;  %804 = vmatprep.mubr.bf16.mxu1 %v1234_v0 }
  0x93   : > { %1109 = vmatmul.mubr.msk.bf16.gmra.mrb[44].mxu0 %vm420_vm0, %v1188_v28  ;;  %1125 = vmatmul.mubr.msk.bf16.gmra.mrb[44].mxu1 %vm420_vm0, %v1188_v28 }
  0x94   : > { %621 = vmatprep.mubr.bf16.mxu0 %v1234_v0  ;;  %814 = vmatprep.mubr.bf16.mxu1 %v1234_v0 }
  0x9b   : > { %1110 = vmatmul.mubr.msk.bf16.gmra.mrb[48].mxu0 %vm420_vm0, %v1189_v29  ;;  %1126 = vmatmul.mubr.msk.bf16.gmra.mrb[48].mxu1 %vm420_vm0, %v1189_v29 }
  0x9c   : > { %631 = vmatprep.mubr.bf16.mxu0 %v1234_v0  ;;  %824 = vmatprep.mubr.bf16.mxu1 %v1234_v0 }
  0xa3   : > { %1111 = vmatmul.mubr.msk.bf16.gmra.mrb[52].mxu0 %vm420_vm0, %v1190_v30  ;;  %1127 = vmatmul.mubr.msk.bf16.gmra.mrb[52].mxu1 %vm420_vm0, %v1190_v30 }
  0xa4   : > { %641 = vmatprep.mubr.bf16.mxu0 %v1234_v0  ;;  %834 = vmatprep.mubr.bf16.mxu1 %v1234_v0 }
  0xab   : > { %1112 = vmatmul.mubr.msk.bf16.gmra.mrb[56].mxu0 %vm420_vm0, %v1191_v31  ;;  %1128 = vmatmul.mubr.msk.bf16.gmra.mrb[56].mxu1 %vm420_vm0, %v1191_v31 }
  0xac   : > { %651 = vmatprep.mubr.bf16.mxu0 %v1234_v0  ;;  %844 = vmatprep.mubr.bf16.mxu1 %v1234_v0 }
  0xb3   : > { %1113 = vmatmul.mubr.msk.bf16.gmra.mrb[60].mxu0 %vm420_vm0, %v1192_v32  ;;  %1129 = vmatmul.mubr.msk.bf16.gmra.mrb[60].mxu1 %vm420_vm0, %v1192_v32 }
 0x10e   : > { %v503_v44 = vpop.f32.mrb[0].mxu0  ;;  %v696_v45 = vpop.f32.mrb[0].mxu1 }
 0x10f   : > { %v504_v46 = vadd.f32 %v503_v44, %v1442_v40  ;;  %v697_v47 = vadd.f32 %v696_v45, %v1444_v41  ;;  %v505_v48 = vpop.f32.mrb[1].mxu0  ;;  %v698_v49 = vpop.f32.mrb[1].mxu1 }
 0x110   : > { %v506_v50 = vadd.f32 %v505_v48, %v1446_v42  ;;  %v699_v51 = vadd.f32 %v698_v49, %v1448_v43  ;;  %v507_v52 = vpop.f32.mrb[2].mxu0  ;;  %v700_v53 = vpop.f32.mrb[2].mxu1 }
 0x111   : > { %855 = vst [vmem:[%s1453_s18] sm:$0xff] %v504_v46  ;;  %857 = vst [vmem:[%s1453_s18 + $0x10] sm:$0xff] %v697_v47  ;;  %v508_v54 = vadd.f32 %v507_v52, %v1442_v40  ;;  %v701_v55 = vadd.f32 %v700_v53, %v1444_v41  ;;  %v509_v56 = vpop.f32.mrb[3].mxu0  ;;  %v702_v57 = vpop.f32.mrb[3].mxu1 }
 0x112   : > { %856 = vst [vmem:[%s1453_s18 + $0x8] sm:$0xff] %v506_v50  ;;  %859 = vst.msk [vmem:[%s1453_s18 + $0x18] sm:$0xff] %vm858_vm1, %v699_v51  ;;  %v510_v58 = vadd.f32 %v509_v56, %v1446_v42  ;;  %v703_v59 = vadd.f32 %v702_v57, %v1448_v43 }
 0x113   : > { %860 = vst [vmem:[%s1453_s18 + $0x20] sm:$0xff] %v508_v54  ;;  %862 = vst [vmem:[%s1453_s18 + $0x30] sm:$0xff] %v701_v55 }
 0x114   : > { %861 = vst [vmem:[%s1453_s18 + $0x28] sm:$0xff] %v510_v58  ;;  %863 = vst.msk [vmem:[%s1453_s18 + $0x38] sm:$0xff] %vm858_vm1, %v703_v59 }
 0x116   : > { %v513_v60 = vpop.f32.mrb[4].mxu0  ;;  %v706_v61 = vpop.f32.mrb[4].mxu1 }
 0x117   : > { %v514_v62 = vadd.f32 %v513_v60, %v1442_v40  ;;  %v707_v63 = vadd.f32 %v706_v61, %v1444_v41  ;;  %v515_v0 = vpop.f32.mrb[5].mxu0  ;;  %v708_v1 = vpop.f32.mrb[5].mxu1 }
 0x118   : > { %v516_v2 = vadd.f32 %v515_v0, %v1446_v42  ;;  %v709_v3 = vadd.f32 %v708_v1, %v1448_v43  ;;  %v517_v4 = vpop.f32.mrb[6].mxu0  ;;  %v710_v5 = vpop.f32.mrb[6].mxu1 }
 0x119   : > { %864 = vst [vmem:[%s1453_s18 + $0x40] sm:$0xff] %v514_v62  ;;  %866 = vst [vmem:[%s1453_s18 + $0x50] sm:$0xff] %v707_v63  ;;  %v518_v6 = vadd.f32 %v517_v4, %v1442_v40  ;;  %v711_v7 = vadd.f32 %v710_v5, %v1444_v41  ;;  %v519_v8 = vpop.f32.mrb[7].mxu0  ;;  %v712_v9 = vpop.f32.mrb[7].mxu1 }
 0x11a   : > { %865 = vst [vmem:[%s1453_s18 + $0x48] sm:$0xff] %v516_v2  ;;  %867 = vst.msk [vmem:[%s1453_s18 + $0x58] sm:$0xff] %vm858_vm1, %v709_v3  ;;  %v520_v10 = vadd.f32 %v519_v8, %v1446_v42  ;;  %v713_v11 = vadd.f32 %v712_v9, %v1448_v43 }
 0x11b   : > { %868 = vst [vmem:[%s1453_s18 + $0x60] sm:$0xff] %v518_v6  ;;  %870 = vst [vmem:[%s1453_s18 + $0x70] sm:$0xff] %v711_v7 }
 0x11c   : > { %869 = vst [vmem:[%s1453_s18 + $0x68] sm:$0xff] %v520_v10  ;;  %871 = vst.msk [vmem:[%s1453_s18 + $0x78] sm:$0xff] %vm858_vm1, %v713_v11 }
 0x11e   : > { %v523_v12 = vpop.f32.mrb[8].mxu0  ;;  %v716_v13 = vpop.f32.mrb[8].mxu1 }
 0x11f   : > { %v524_v14 = vadd.f32 %v523_v12, %v1442_v40  ;;  %v717_v15 = vadd.f32 %v716_v13, %v1444_v41  ;;  %v525_v16 = vpop.f32.mrb[9].mxu0  ;;  %v718_v17 = vpop.f32.mrb[9].mxu1 }
 0x120   : > { %v526_v18 = vadd.f32 %v525_v16, %v1446_v42  ;;  %v719_v19 = vadd.f32 %v718_v17, %v1448_v43  ;;  %v527_v20 = vpop.f32.mrb[10].mxu0  ;;  %v720_v21 = vpop.f32.mrb[10].mxu1 }
 0x121   : > { %872 = vst [vmem:[%s1453_s18 + $0x80] sm:$0xff] %v524_v14  ;;  %874 = vst [vmem:[%s1453_s18 + $0x90] sm:$0xff] %v717_v15  ;;  %v528_v22 = vadd.f32 %v527_v20, %v1442_v40  ;;  %v721_v23 = vadd.f32 %v720_v21, %v1444_v41  ;;  %v529_v24 = vpop.f32.mrb[11].mxu0  ;;  %v722_v25 = vpop.f32.mrb[11].mxu1 }
 0x122   : > { %873 = vst [vmem:[%s1453_s18 + $0x88] sm:$0xff] %v526_v18  ;;  %875 = vst.msk [vmem:[%s1453_s18 + $0x98] sm:$0xff] %vm858_vm1, %v719_v19  ;;  %v530_v26 = vadd.f32 %v529_v24, %v1446_v42  ;;  %v723_v27 = vadd.f32 %v722_v25, %v1448_v43 }
 0x123   : > { %876 = vst [vmem:[%s1453_s18 + $0xa0] sm:$0xff] %v528_v22  ;;  %878 = vst [vmem:[%s1453_s18 + $0xb0] sm:$0xff] %v721_v23 }
 0x124   : > { %877 = vst [vmem:[%s1453_s18 + $0xa8] sm:$0xff] %v530_v26  ;;  %879 = vst.msk [vmem:[%s1453_s18 + $0xb8] sm:$0xff] %vm858_vm1, %v723_v27 }
 0x126   : > { %v533_v28 = vpop.f32.mrb[12].mxu0  ;;  %v726_v29 = vpop.f32.mrb[12].mxu1 }
 0x127   : > { %v534_v30 = vadd.f32 %v533_v28, %v1442_v40  ;;  %v727_v31 = vadd.f32 %v726_v29, %v1444_v41  ;;  %v535_v32 = vpop.f32.mrb[13].mxu0  ;;  %v728_v33 = vpop.f32.mrb[13].mxu1 }
 0x128   : > { %v536_v34 = vadd.f32 %v535_v32, %v1446_v42  ;;  %v729_v35 = vadd.f32 %v728_v33, %v1448_v43  ;;  %v537_v36 = vpop.f32.mrb[14].mxu0  ;;  %v730_v37 = vpop.f32.mrb[14].mxu1 }
 0x129   : > { %880 = vst [vmem:[%s1453_s18 + $0xc0] sm:$0xff] %v534_v30  ;;  %882 = vst [vmem:[%s1453_s18 + $0xd0] sm:$0xff] %v727_v31  ;;  %v538_v38 = vadd.f32 %v537_v36, %v1442_v40  ;;  %v731_v39 = vadd.f32 %v730_v37, %v1444_v41  ;;  %v539_v44 = vpop.f32.mrb[15].mxu0  ;;  %v732_v45 = vpop.f32.mrb[15].mxu1 }
 0x12a   : > { %881 = vst [vmem:[%s1453_s18 + $0xc8] sm:$0xff] %v536_v34  ;;  %883 = vst.msk [vmem:[%s1453_s18 + $0xd8] sm:$0xff] %vm858_vm1, %v729_v35  ;;  %v540_v46 = vadd.f32 %v539_v44, %v1446_v42  ;;  %v733_v47 = vadd.f32 %v732_v45, %v1448_v43 }
 0x12b   : > { %884 = vst [vmem:[%s1453_s18 + $0xe0] sm:$0xff] %v538_v38  ;;  %886 = vst [vmem:[%s1453_s18 + $0xf0] sm:$0xff] %v731_v39 }
 0x12c   : > { %885 = vst [vmem:[%s1453_s18 + $0xe8] sm:$0xff] %v540_v46  ;;  %887 = vst.msk [vmem:[%s1453_s18 + $0xf8] sm:$0xff] %vm858_vm1, %v733_v47 }
 0x12e   : > { %v543_v48 = vpop.f32.mrb[16].mxu0  ;;  %v736_v49 = vpop.f32.mrb[16].mxu1 }
 0x12f   : > { %v544_v50 = vadd.f32 %v543_v48, %v1442_v40  ;;  %v737_v51 = vadd.f32 %v736_v49, %v1444_v41  ;;  %v545_v52 = vpop.f32.mrb[17].mxu0  ;;  %v738_v53 = vpop.f32.mrb[17].mxu1 }
 0x130   : > { %v546_v54 = vadd.f32 %v545_v52, %v1446_v42  ;;  %v739_v55 = vadd.f32 %v738_v53, %v1448_v43  ;;  %v547_v56 = vpop.f32.mrb[18].mxu0  ;;  %v740_v57 = vpop.f32.mrb[18].mxu1 }
 0x131   : > { %888 = vst [vmem:[%s1453_s18 + $0x100] sm:$0xff] %v544_v50  ;;  %890 = vst [vmem:[%s1453_s18 + $0x110] sm:$0xff] %v737_v51  ;;  %v548_v58 = vadd.f32 %v547_v56, %v1442_v40  ;;  %v741_v59 = vadd.f32 %v740_v57, %v1444_v41  ;;  %v549_v60 = vpop.f32.mrb[19].mxu0  ;;  %v742_v61 = vpop.f32.mrb[19].mxu1 }
 0x132   : > { %889 = vst [vmem:[%s1453_s18 + $0x108] sm:$0xff] %v546_v54  ;;  %891 = vst.msk [vmem:[%s1453_s18 + $0x118] sm:$0xff] %vm858_vm1, %v739_v55  ;;  %v550_v62 = vadd.f32 %v549_v60, %v1446_v42  ;;  %v743_v63 = vadd.f32 %v742_v61, %v1448_v43 }
 0x133   : > { %892 = vst [vmem:[%s1453_s18 + $0x120] sm:$0xff] %v548_v58  ;;  %894 = vst [vmem:[%s1453_s18 + $0x130] sm:$0xff] %v741_v59 }
 0x134   : > { %893 = vst [vmem:[%s1453_s18 + $0x128] sm:$0xff] %v550_v62  ;;  %895 = vst.msk [vmem:[%s1453_s18 + $0x138] sm:$0xff] %vm858_vm1, %v743_v63 }
 0x136   : > { %v553_v0 = vpop.f32.mrb[20].mxu0  ;;  %v746_v1 = vpop.f32.mrb[20].mxu1 }
 0x137   : > { %v554_v2 = vadd.f32 %v553_v0, %v1442_v40  ;;  %v747_v3 = vadd.f32 %v746_v1, %v1444_v41  ;;  %v555_v4 = vpop.f32.mrb[21].mxu0  ;;  %v748_v5 = vpop.f32.mrb[21].mxu1 }
 0x138   : > { %v556_v6 = vadd.f32 %v555_v4, %v1446_v42  ;;  %v749_v7 = vadd.f32 %v748_v5, %v1448_v43  ;;  %v557_v8 = vpop.f32.mrb[22].mxu0  ;;  %v750_v9 = vpop.f32.mrb[22].mxu1 }
 0x139   : > { %896 = vst [vmem:[%s1453_s18 + $0x140] sm:$0xff] %v554_v2  ;;  %898 = vst [vmem:[%s1453_s18 + $0x150] sm:$0xff] %v747_v3  ;;  %v558_v10 = vadd.f32 %v557_v8, %v1442_v40  ;;  %v751_v11 = vadd.f32 %v750_v9, %v1444_v41  ;;  %v559_v12 = vpop.f32.mrb[23].mxu0  ;;  %v752_v13 = vpop.f32.mrb[23].mxu1 }
 0x13a   : > { %897 = vst [vmem:[%s1453_s18 + $0x148] sm:$0xff] %v556_v6  ;;  %899 = vst.msk [vmem:[%s1453_s18 + $0x158] sm:$0xff] %vm858_vm1, %v749_v7  ;;  %v560_v14 = vadd.f32 %v559_v12, %v1446_v42  ;;  %v753_v15 = vadd.f32 %v752_v13, %v1448_v43 }
 0x13b   : > { %900 = vst [vmem:[%s1453_s18 + $0x160] sm:$0xff] %v558_v10  ;;  %902 = vst [vmem:[%s1453_s18 + $0x170] sm:$0xff] %v751_v11 }
 0x13c   : > { %901 = vst [vmem:[%s1453_s18 + $0x168] sm:$0xff] %v560_v14  ;;  %903 = vst.msk [vmem:[%s1453_s18 + $0x178] sm:$0xff] %vm858_vm1, %v753_v15 }
 0x13e   : > { %v563_v16 = vpop.f32.mrb[24].mxu0  ;;  %v756_v17 = vpop.f32.mrb[24].mxu1 }
 0x13f   : > { %v564_v18 = vadd.f32 %v563_v16, %v1442_v40  ;;  %v757_v19 = vadd.f32 %v756_v17, %v1444_v41  ;;  %v565_v20 = vpop.f32.mrb[25].mxu0  ;;  %v758_v21 = vpop.f32.mrb[25].mxu1 }
 0x140   : > { %v566_v22 = vadd.f32 %v565_v20, %v1446_v42  ;;  %v759_v23 = vadd.f32 %v758_v21, %v1448_v43  ;;  %v567_v24 = vpop.f32.mrb[26].mxu0  ;;  %v760_v25 = vpop.f32.mrb[26].mxu1 }
 0x141   : > { %904 = vst [vmem:[%s1453_s18 + $0x180] sm:$0xff] %v564_v18  ;;  %906 = vst [vmem:[%s1453_s18 + $0x190] sm:$0xff] %v757_v19  ;;  %v568_v26 = vadd.f32 %v567_v24, %v1442_v40  ;;  %v761_v27 = vadd.f32 %v760_v25, %v1444_v41  ;;  %v569_v28 = vpop.f32.mrb[27].mxu0  ;;  %v762_v29 = vpop.f32.mrb[27].mxu1 }
 0x142   : > { %905 = vst [vmem:[%s1453_s18 + $0x188] sm:$0xff] %v566_v22  ;;  %907 = vst.msk [vmem:[%s1453_s18 + $0x198] sm:$0xff] %vm858_vm1, %v759_v23  ;;  %v570_v30 = vadd.f32 %v569_v28, %v1446_v42  ;;  %v763_v31 = vadd.f32 %v762_v29, %v1448_v43 }
 0x143   : > { %908 = vst [vmem:[%s1453_s18 + $0x1a0] sm:$0xff] %v568_v26  ;;  %910 = vst [vmem:[%s1453_s18 + $0x1b0] sm:$0xff] %v761_v27 }
 0x144   : > { %909 = vst [vmem:[%s1453_s18 + $0x1a8] sm:$0xff] %v570_v30  ;;  %911 = vst.msk [vmem:[%s1453_s18 + $0x1b8] sm:$0xff] %vm858_vm1, %v763_v31 }
 0x146   : > { %v573_v32 = vpop.f32.mrb[28].mxu0  ;;  %v766_v33 = vpop.f32.mrb[28].mxu1 }
 0x147   : > { %v574_v34 = vadd.f32 %v573_v32, %v1442_v40  ;;  %v767_v35 = vadd.f32 %v766_v33, %v1444_v41  ;;  %v575_v36 = vpop.f32.mrb[29].mxu0  ;;  %v768_v37 = vpop.f32.mrb[29].mxu1 }
 0x148   : > { %v576_v38 = vadd.f32 %v575_v36, %v1446_v42  ;;  %v769_v39 = vadd.f32 %v768_v37, %v1448_v43  ;;  %v577_v44 = vpop.f32.mrb[30].mxu0  ;;  %v770_v45 = vpop.f32.mrb[30].mxu1 }
 0x149   : > { %912 = vst [vmem:[%s1453_s18 + $0x1c0] sm:$0xff] %v574_v34  ;;  %914 = vst [vmem:[%s1453_s18 + $0x1d0] sm:$0xff] %v767_v35  ;;  %v578_v46 = vadd.f32 %v577_v44, %v1442_v40  ;;  %v771_v47 = vadd.f32 %v770_v45, %v1444_v41  ;;  %v579_v48 = vpop.f32.mrb[31].mxu0  ;;  %v772_v49 = vpop.f32.mrb[31].mxu1 }
 0x14a   : > { %913 = vst [vmem:[%s1453_s18 + $0x1c8] sm:$0xff] %v576_v38  ;;  %915 = vst.msk [vmem:[%s1453_s18 + $0x1d8] sm:$0xff] %vm858_vm1, %v769_v39  ;;  %v580_v50 = vadd.f32 %v579_v48, %v1446_v42  ;;  %v773_v51 = vadd.f32 %v772_v49, %v1448_v43 }
 0x14b   : > { %916 = vst [vmem:[%s1453_s18 + $0x1e0] sm:$0xff] %v578_v46  ;;  %918 = vst [vmem:[%s1453_s18 + $0x1f0] sm:$0xff] %v771_v47 }
 0x14c   : > { %917 = vst [vmem:[%s1453_s18 + $0x1e8] sm:$0xff] %v580_v50  ;;  %919 = vst.msk [vmem:[%s1453_s18 + $0x1f8] sm:$0xff] %vm858_vm1, %v773_v51 }
 0x14e   : > { %v583_v52 = vpop.f32.mrb[32].mxu0  ;;  %v776_v53 = vpop.f32.mrb[32].mxu1 }
 0x14f   : > { %v584_v54 = vadd.f32 %v583_v52, %v1442_v40  ;;  %v777_v55 = vadd.f32 %v776_v53, %v1444_v41  ;;  %v585_v56 = vpop.f32.mrb[33].mxu0  ;;  %v778_v57 = vpop.f32.mrb[33].mxu1 }
 0x150   : > { %v586_v58 = vadd.f32 %v585_v56, %v1446_v42  ;;  %v779_v59 = vadd.f32 %v778_v57, %v1448_v43  ;;  %v587_v60 = vpop.f32.mrb[34].mxu0  ;;  %v780_v61 = vpop.f32.mrb[34].mxu1 }
 0x151   : > { %920 = vst [vmem:[%s1453_s18 + $0x200] sm:$0xff] %v584_v54  ;;  %922 = vst [vmem:[%s1453_s18 + $0x210] sm:$0xff] %v777_v55  ;;  %v588_v62 = vadd.f32 %v587_v60, %v1442_v40  ;;  %v781_v63 = vadd.f32 %v780_v61, %v1444_v41  ;;  %v589_v0 = vpop.f32.mrb[35].mxu0  ;;  %v782_v1 = vpop.f32.mrb[35].mxu1 }
 0x152   : > { %921 = vst [vmem:[%s1453_s18 + $0x208] sm:$0xff] %v586_v58  ;;  %923 = vst.msk [vmem:[%s1453_s18 + $0x218] sm:$0xff] %vm858_vm1, %v779_v59  ;;  %v590_v2 = vadd.f32 %v589_v0, %v1446_v42  ;;  %v783_v3 = vadd.f32 %v782_v1, %v1448_v43 }
 0x153   : > { %924 = vst [vmem:[%s1453_s18 + $0x220] sm:$0xff] %v588_v62  ;;  %926 = vst [vmem:[%s1453_s18 + $0x230] sm:$0xff] %v781_v63 }
 0x154   : > { %925 = vst [vmem:[%s1453_s18 + $0x228] sm:$0xff] %v590_v2  ;;  %927 = vst.msk [vmem:[%s1453_s18 + $0x238] sm:$0xff] %vm858_vm1, %v783_v3 }
 0x156   : > { %v593_v4 = vpop.f32.mrb[36].mxu0  ;;  %v786_v5 = vpop.f32.mrb[36].mxu1 }
 0x157   : > { %v594_v6 = vadd.f32 %v593_v4, %v1442_v40  ;;  %v787_v7 = vadd.f32 %v786_v5, %v1444_v41  ;;  %v595_v8 = vpop.f32.mrb[37].mxu0  ;;  %v788_v9 = vpop.f32.mrb[37].mxu1 }
 0x158   : > { %v596_v10 = vadd.f32 %v595_v8, %v1446_v42  ;;  %v789_v11 = vadd.f32 %v788_v9, %v1448_v43  ;;  %v597_v12 = vpop.f32.mrb[38].mxu0  ;;  %v790_v13 = vpop.f32.mrb[38].mxu1 }
 0x159   : > { %928 = vst [vmem:[%s1453_s18 + $0x240] sm:$0xff] %v594_v6  ;;  %930 = vst [vmem:[%s1453_s18 + $0x250] sm:$0xff] %v787_v7  ;;  %v598_v14 = vadd.f32 %v597_v12, %v1442_v40  ;;  %v791_v15 = vadd.f32 %v790_v13, %v1444_v41  ;;  %v599_v16 = vpop.f32.mrb[39].mxu0  ;;  %v792_v17 = vpop.f32.mrb[39].mxu1 }
 0x15a   : > { %929 = vst [vmem:[%s1453_s18 + $0x248] sm:$0xff] %v596_v10  ;;  %931 = vst.msk [vmem:[%s1453_s18 + $0x258] sm:$0xff] %vm858_vm1, %v789_v11  ;;  %v600_v18 = vadd.f32 %v599_v16, %v1446_v42  ;;  %v793_v19 = vadd.f32 %v792_v17, %v1448_v43 }
 0x15b   : > { %932 = vst [vmem:[%s1453_s18 + $0x260] sm:$0xff] %v598_v14  ;;  %934 = vst [vmem:[%s1453_s18 + $0x270] sm:$0xff] %v791_v15 }
 0x15c   : > { %933 = vst [vmem:[%s1453_s18 + $0x268] sm:$0xff] %v600_v18  ;;  %935 = vst.msk [vmem:[%s1453_s18 + $0x278] sm:$0xff] %vm858_vm1, %v793_v19 }
 0x15e   : > { %v603_v20 = vpop.f32.mrb[40].mxu0  ;;  %v796_v21 = vpop.f32.mrb[40].mxu1 }
 0x15f   : > { %v604_v22 = vadd.f32 %v603_v20, %v1442_v40  ;;  %v797_v23 = vadd.f32 %v796_v21, %v1444_v41  ;;  %v605_v24 = vpop.f32.mrb[41].mxu0  ;;  %v798_v25 = vpop.f32.mrb[41].mxu1 }
 0x160   : > { %v606_v26 = vadd.f32 %v605_v24, %v1446_v42  ;;  %v799_v27 = vadd.f32 %v798_v25, %v1448_v43  ;;  %v607_v28 = vpop.f32.mrb[42].mxu0  ;;  %v800_v29 = vpop.f32.mrb[42].mxu1 }
 0x161   : > { %936 = vst [vmem:[%s1453_s18 + $0x280] sm:$0xff] %v604_v22  ;;  %938 = vst [vmem:[%s1453_s18 + $0x290] sm:$0xff] %v797_v23  ;;  %v608_v30 = vadd.f32 %v607_v28, %v1442_v40  ;;  %v801_v31 = vadd.f32 %v800_v29, %v1444_v41  ;;  %v609_v32 = vpop.f32.mrb[43].mxu0  ;;  %v802_v33 = vpop.f32.mrb[43].mxu1 }
 0x162   : > { %937 = vst [vmem:[%s1453_s18 + $0x288] sm:$0xff] %v606_v26  ;;  %939 = vst.msk [vmem:[%s1453_s18 + $0x298] sm:$0xff] %vm858_vm1, %v799_v27  ;;  %v610_v34 = vadd.f32 %v609_v32, %v1446_v42  ;;  %v803_v35 = vadd.f32 %v802_v33, %v1448_v43 }
 0x163   : > { %940 = vst [vmem:[%s1453_s18 + $0x2a0] sm:$0xff] %v608_v30  ;;  %942 = vst [vmem:[%s1453_s18 + $0x2b0] sm:$0xff] %v801_v31 }
 0x164   : > { %941 = vst [vmem:[%s1453_s18 + $0x2a8] sm:$0xff] %v610_v34  ;;  %943 = vst.msk [vmem:[%s1453_s18 + $0x2b8] sm:$0xff] %vm858_vm1, %v803_v35 }
 0x166   : > { %v613_v36 = vpop.f32.mrb[44].mxu0  ;;  %v806_v37 = vpop.f32.mrb[44].mxu1 }
 0x167   : > { %v614_v38 = vadd.f32 %v613_v36, %v1442_v40  ;;  %v807_v39 = vadd.f32 %v806_v37, %v1444_v41  ;;  %v615_v44 = vpop.f32.mrb[45].mxu0  ;;  %v808_v45 = vpop.f32.mrb[45].mxu1 }
 0x168   : > { %v616_v46 = vadd.f32 %v615_v44, %v1446_v42  ;;  %v809_v47 = vadd.f32 %v808_v45, %v1448_v43  ;;  %v617_v48 = vpop.f32.mrb[46].mxu0  ;;  %v810_v49 = vpop.f32.mrb[46].mxu1 }
 0x169   : > { %944 = vst [vmem:[%s1453_s18 + $0x2c0] sm:$0xff] %v614_v38  ;;  %946 = vst [vmem:[%s1453_s18 + $0x2d0] sm:$0xff] %v807_v39  ;;  %v618_v50 = vadd.f32 %v617_v48, %v1442_v40  ;;  %v811_v51 = vadd.f32 %v810_v49, %v1444_v41  ;;  %v619_v52 = vpop.f32.mrb[47].mxu0  ;;  %v812_v53 = vpop.f32.mrb[47].mxu1 }
 0x16a   : > { %945 = vst [vmem:[%s1453_s18 + $0x2c8] sm:$0xff] %v616_v46  ;;  %947 = vst.msk [vmem:[%s1453_s18 + $0x2d8] sm:$0xff] %vm858_vm1, %v809_v47  ;;  %v620_v54 = vadd.f32 %v619_v52, %v1446_v42  ;;  %v813_v55 = vadd.f32 %v812_v53, %v1448_v43 }
 0x16b   : > { %948 = vst [vmem:[%s1453_s18 + $0x2e0] sm:$0xff] %v618_v50  ;;  %950 = vst [vmem:[%s1453_s18 + $0x2f0] sm:$0xff] %v811_v51 }
 0x16c   : > { %949 = vst [vmem:[%s1453_s18 + $0x2e8] sm:$0xff] %v620_v54  ;;  %951 = vst.msk [vmem:[%s1453_s18 + $0x2f8] sm:$0xff] %vm858_vm1, %v813_v55 }
 0x16e   : > { %v623_v56 = vpop.f32.mrb[48].mxu0  ;;  %v816_v57 = vpop.f32.mrb[48].mxu1 }
 0x16f   : > { %v624_v58 = vadd.f32 %v623_v56, %v1442_v40  ;;  %v817_v59 = vadd.f32 %v816_v57, %v1444_v41  ;;  %v625_v60 = vpop.f32.mrb[49].mxu0  ;;  %v818_v61 = vpop.f32.mrb[49].mxu1 }
 0x170   : > { %v626_v62 = vadd.f32 %v625_v60, %v1446_v42  ;;  %v819_v63 = vadd.f32 %v818_v61, %v1448_v43  ;;  %v627_v0 = vpop.f32.mrb[50].mxu0  ;;  %v820_v1 = vpop.f32.mrb[50].mxu1 }
 0x171   : > { %952 = vst [vmem:[%s1453_s18 + $0x300] sm:$0xff] %v624_v58  ;;  %954 = vst [vmem:[%s1453_s18 + $0x310] sm:$0xff] %v817_v59  ;;  %v628_v2 = vadd.f32 %v627_v0, %v1442_v40  ;;  %v821_v3 = vadd.f32 %v820_v1, %v1444_v41  ;;  %v629_v4 = vpop.f32.mrb[51].mxu0  ;;  %v822_v5 = vpop.f32.mrb[51].mxu1 }
 0x172   : > { %953 = vst [vmem:[%s1453_s18 + $0x308] sm:$0xff] %v626_v62  ;;  %955 = vst.msk [vmem:[%s1453_s18 + $0x318] sm:$0xff] %vm858_vm1, %v819_v63  ;;  %v630_v6 = vadd.f32 %v629_v4, %v1446_v42  ;;  %v823_v7 = vadd.f32 %v822_v5, %v1448_v43 }
 0x173   : > { %956 = vst [vmem:[%s1453_s18 + $0x320] sm:$0xff] %v628_v2  ;;  %958 = vst [vmem:[%s1453_s18 + $0x330] sm:$0xff] %v821_v3 }
 0x174   : > { %957 = vst [vmem:[%s1453_s18 + $0x328] sm:$0xff] %v630_v6  ;;  %959 = vst.msk [vmem:[%s1453_s18 + $0x338] sm:$0xff] %vm858_vm1, %v823_v7 }
 0x176   : > { %v633_v8 = vpop.f32.mrb[52].mxu0  ;;  %v826_v9 = vpop.f32.mrb[52].mxu1 }
 0x177   : > { %v634_v10 = vadd.f32 %v633_v8, %v1442_v40  ;;  %v827_v11 = vadd.f32 %v826_v9, %v1444_v41  ;;  %v635_v12 = vpop.f32.mrb[53].mxu0  ;;  %v828_v13 = vpop.f32.mrb[53].mxu1 }
 0x178   : > { %v636_v14 = vadd.f32 %v635_v12, %v1446_v42  ;;  %v829_v15 = vadd.f32 %v828_v13, %v1448_v43  ;;  %v637_v16 = vpop.f32.mrb[54].mxu0  ;;  %v830_v17 = vpop.f32.mrb[54].mxu1 }
 0x179   : > { %960 = vst [vmem:[%s1453_s18 + $0x340] sm:$0xff] %v634_v10  ;;  %962 = vst [vmem:[%s1453_s18 + $0x350] sm:$0xff] %v827_v11  ;;  %v638_v18 = vadd.f32 %v637_v16, %v1442_v40  ;;  %v831_v19 = vadd.f32 %v830_v17, %v1444_v41  ;;  %v639_v20 = vpop.f32.mrb[55].mxu0  ;;  %v832_v21 = vpop.f32.mrb[55].mxu1 }
 0x17a   : > { %961 = vst [vmem:[%s1453_s18 + $0x348] sm:$0xff] %v636_v14  ;;  %963 = vst.msk [vmem:[%s1453_s18 + $0x358] sm:$0xff] %vm858_vm1, %v829_v15  ;;  %v640_v22 = vadd.f32 %v639_v20, %v1446_v42  ;;  %v833_v23 = vadd.f32 %v832_v21, %v1448_v43 }
 0x17b   : > { %964 = vst [vmem:[%s1453_s18 + $0x360] sm:$0xff] %v638_v18  ;;  %966 = vst [vmem:[%s1453_s18 + $0x370] sm:$0xff] %v831_v19 }
 0x17c   : > { %965 = vst [vmem:[%s1453_s18 + $0x368] sm:$0xff] %v640_v22  ;;  %967 = vst.msk [vmem:[%s1453_s18 + $0x378] sm:$0xff] %vm858_vm1, %v833_v23 }
 0x17e   : > { %v643_v24 = vpop.f32.mrb[56].mxu0  ;;  %v836_v25 = vpop.f32.mrb[56].mxu1 }
 0x17f   : > { %v644_v26 = vadd.f32 %v643_v24, %v1442_v40  ;;  %v837_v27 = vadd.f32 %v836_v25, %v1444_v41  ;;  %v645_v28 = vpop.f32.mrb[57].mxu0  ;;  %v838_v29 = vpop.f32.mrb[57].mxu1 }
 0x180   : > { %v646_v30 = vadd.f32 %v645_v28, %v1446_v42  ;;  %v839_v31 = vadd.f32 %v838_v29, %v1448_v43  ;;  %v647_v32 = vpop.f32.mrb[58].mxu0  ;;  %v840_v33 = vpop.f32.mrb[58].mxu1 }
 0x181   : > { %968 = vst [vmem:[%s1453_s18 + $0x380] sm:$0xff] %v644_v26  ;;  %970 = vst [vmem:[%s1453_s18 + $0x390] sm:$0xff] %v837_v27  ;;  %v648_v34 = vadd.f32 %v647_v32, %v1442_v40  ;;  %v841_v35 = vadd.f32 %v840_v33, %v1444_v41  ;;  %v649_v36 = vpop.f32.mrb[59].mxu0  ;;  %v842_v37 = vpop.f32.mrb[59].mxu1 }
 0x182   : > { %969 = vst [vmem:[%s1453_s18 + $0x388] sm:$0xff] %v646_v30  ;;  %971 = vst.msk [vmem:[%s1453_s18 + $0x398] sm:$0xff] %vm858_vm1, %v839_v31  ;;  %v650_v38 = vadd.f32 %v649_v36, %v1446_v42  ;;  %v843_v39 = vadd.f32 %v842_v37, %v1448_v43 }
 0x183   : > { %972 = vst [vmem:[%s1453_s18 + $0x3a0] sm:$0xff] %v648_v34  ;;  %974 = vst [vmem:[%s1453_s18 + $0x3b0] sm:$0xff] %v841_v35 }
 0x184   : > { %973 = vst [vmem:[%s1453_s18 + $0x3a8] sm:$0xff] %v650_v38  ;;  %975 = vst.msk [vmem:[%s1453_s18 + $0x3b8] sm:$0xff] %vm858_vm1, %v843_v39 }
 0x186   : > { %v653_v44 = vpop.f32.mrb[60].mxu0  ;;  %v846_v45 = vpop.f32.mrb[60].mxu1 }
 0x187   : > { %v654_v46 = vadd.f32 %v653_v44, %v1442_v40  ;;  %v847_v47 = vadd.f32 %v846_v45, %v1444_v41  ;;  %v655_v48 = vpop.f32.mrb[61].mxu0  ;;  %v848_v49 = vpop.f32.mrb[61].mxu1 }
 0x188   : > { %v656_v50 = vadd.f32 %v655_v48, %v1446_v42  ;;  %v849_v51 = vadd.f32 %v848_v49, %v1448_v43  ;;  %v657_v52 = vpop.f32.mrb[62].mxu0  ;;  %v850_v53 = vpop.f32.mrb[62].mxu1 }
 0x189   : > { %976 = vst [vmem:[%s1453_s18 + $0x3c0] sm:$0xff] %v654_v46  ;;  %978 = vst [vmem:[%s1453_s18 + $0x3d0] sm:$0xff] %v847_v47  ;;  %v658_v54 = vadd.f32 %v657_v52, %v1442_v40  ;;  %v851_v55 = vadd.f32 %v850_v53, %v1444_v41  ;;  %v659_v56 = vpop.f32.mrb[63].mxu0  ;;  %v852_v57 = vpop.f32.mrb[63].mxu1 }
 0x18a   : > { %977 = vst [vmem:[%s1453_s18 + $0x3c8] sm:$0xff] %v656_v50  ;;  %979 = vst.msk [vmem:[%s1453_s18 + $0x3d8] sm:$0xff] %vm858_vm1, %v849_v51  ;;  %v660_v58 = vadd.f32 %v659_v56, %v1446_v42  ;;  %v853_v59 = vadd.f32 %v852_v57, %v1448_v43 }
 0x18b   : > { %980 = vst [vmem:[%s1453_s18 + $0x3e0] sm:$0xff] %v658_v54  ;;  %982 = vst [vmem:[%s1453_s18 + $0x3f0] sm:$0xff] %v851_v55 }
 0x18c   : > { %981 = vst [vmem:[%s1453_s18 + $0x3e8] sm:$0xff] %v660_v58  ;;  %983 = vst.msk [vmem:[%s1453_s18 + $0x3f8] sm:$0xff] %vm858_vm1, %v853_v59 }
 0x18d PF: > { %s14_s12 = sadd.s32 1, %s1231_s12  }
 0x18e   : > { %p11_p3 = scmp.ge.s32.totalorder %s14_s12, 4  }
 0x190   :  { %13 = sbr.rel (!%p11_p3) target bundleno = 1 (0x1), region = 67 }
 0x197   :  { %1008 = vsyncpa [#allocation3], 1 }
 0x198   :  { %1010 = vsyncpa [#allocation3 + $0x1], 1 }

</bundles_post_ra>
